<compile_context>
chip_gen: v6e
topology: v6e:2x2x1
jax: 0.10.0
libtpu: 0.0.40
codegen_flags: <defaults>
</compile_context>

<pallas_src>
import functools

import jax
import jax.numpy as jnp
from jax import lax
from jax.experimental import pallas as pl
from jax.experimental.pallas import tpu as pltpu


def _round_up(x: int, m: int) -> int:
    return ((x + m - 1) // m) * m


def shared_decoder_kernel(x_ref, w_ref, b_ref, o_ref, acc_ref):
    """x_ref: (tm, tk)  w_ref: (tn, tk)  b_ref: (1, tn)  o_ref: (tm, tn)."""
    k = pl.program_id(2)

    @pl.when(k == 0)
    def _():
        acc_ref[...] = jnp.zeros_like(acc_ref)

    # Contract K of x with K of w: (tm, tk) x (tn, tk) -> (tm, tn).
    acc_ref[...] += lax.dot_general(
        x_ref[...],
        w_ref[...],
        dimension_numbers=(((1,), (1,)), ((), ())),
        preferred_element_type=jnp.float32,
    )

    @pl.when(k == pl.num_programs(2) - 1)
    def _():
        o_ref[...] = jnp.maximum(acc_ref[...] + b_ref[...], 0.0).astype(o_ref.dtype)


@functools.partial(jax.jit, static_argnames=())
def shared_decoder_forward(x, weight, bias):
    """x: (M, in_feats) f32; weight: (out_dim, in_feats) f32 (PyTorch layout);
    bias: (out_dim,) f32.  Returns relu(x @ weight.T + bias), shape (M, out_dim)."""
    M, K = x.shape
    N = weight.shape[0]

    # Tile sizes: big as reasonable (512 caps), collapse to whole array when
    # the (padded) dim is smaller.
    tm = min(512, _round_up(M, 8))
    tn = min(512, _round_up(N, 128))
    tk = min(512, _round_up(K, 128))

    M_pad = _round_up(M, tm)
    N_pad = _round_up(N, tn)
    K_pad = _round_up(K, tk)

    # Zero-pad once (fused under jit); zeros in K contribute nothing to the
    # dot, padded N columns / M rows are sliced away at the end.
    x_p = jnp.pad(x, ((0, M_pad - M), (0, K_pad - K)))
    w_p = jnp.pad(weight, ((0, N_pad - N), (0, K_pad - K)))       # stays (N, K)
    b_p = jnp.pad(bias, (0, N_pad - N)).reshape(1, N_pad)

    grid = (M_pad // tm, N_pad // tn, K_pad // tk)

    cost = pl.CostEstimate(
        flops=2 * M_pad * K_pad * N_pad,
        transcendentals=0,
        bytes_accessed=4 * (M_pad * K_pad + N_pad * K_pad + N_pad + M_pad * N_pad),
    )

    out_p = pl.pallas_call(
        shared_decoder_kernel,
        out_shape=jax.ShapeDtypeStruct((M_pad, N_pad), x.dtype),
        grid=grid,
        in_specs=[
            pl.BlockSpec((tm, tk), lambda i, j, k: (i, k)),   # x tile
            pl.BlockSpec((tn, tk), lambda i, j, k: (j, k)),   # weight tile (N, K)
            pl.BlockSpec((1, tn), lambda i, j, k: (0, j)),    # bias tile
        ],
        out_specs=pl.BlockSpec((tm, tn), lambda i, j, k: (i, j)),
        scratch_shapes=[pltpu.VMEM((tm, tn), jnp.float32)],
        compiler_params=pltpu.CompilerParams(
            dimension_semantics=("parallel", "parallel", "arbitrary"),
        ),
        cost_estimate=cost,
    )(x_p, w_p, b_p)

    return out_p[:M, :N]


if __name__ == "__main__":
    # Small shapes implied by the module: (batch, in_feats) -> (batch, out_dim)
    batch, in_feats, out_dim = 16, 32, 64

    key = jax.random.PRNGKey(0)
    kx, kw, kb = jax.random.split(key, 3)
    x = jax.random.normal(kx, (batch, in_feats), dtype=jnp.float32)
    # Deterministic parameter init (synthetic; mimics nn.Linear param shapes).
    weight = jax.random.normal(kw, (out_dim, in_feats), dtype=jnp.float32) * 0.1
    bias = jax.random.normal(kb, (out_dim,), dtype=jnp.float32) * 0.1

    out = shared_decoder_forward(x, weight, bias)
    out = jax.block_until_ready(out)

    # Reference check in plain JAX.
    ref = jnp.maximum(x @ weight.T + bias, 0.0)
    assert out.shape == (batch, out_dim)
    assert jnp.allclose(out, ref, atol=1e-5, rtol=1e-5)

    print("KERNEL_OK")
</pallas_src>

<mosaic_0001>
module attributes {stable_mosaic.version = 11 : i64} {
  func.func @shared_decoder_kernel(%arg0: i32, %arg1: i32, %arg2: i32, %arg3: memref<16x128xf32, #tpu.memory_space<vmem>>, %arg4: memref<128x128xf32, #tpu.memory_space<vmem>>, %arg5: memref<1x128xf32, #tpu.memory_space<vmem>>, %arg6: memref<16x128xf32, #tpu.memory_space<vmem>>, %arg7: memref<16x128xf32, #tpu.memory_space<vmem>>) attributes {dimension_semantics = [#tpu.dimension_semantics<parallel>, #tpu.dimension_semantics<parallel>, #tpu.dimension_semantics<arbitrary>], iteration_bounds = array<i64: 1, 1, 1>, scalar_prefetch = 0 : i64, scratch_operands = 1 : i64, tpu.core_type = #tpu.core_type<tc>, window_params = [{transform_indices = @transform_0, window_bounds = array<i64: 16, 128>}, {transform_indices = @transform_1, window_bounds = array<i64: 128, 128>}, {transform_indices = @transform_2, window_bounds = array<i64: 1, 128>}, {transform_indices = @transform_3, window_bounds = array<i64: 16, 128>}]} {
    %c0_i32 = arith.constant 0 : i32
    %0 = arith.cmpi eq, %arg2, %c0_i32 : i32
    %1 = arith.extui %0 : i1 to i32
    %c0_i32_0 = arith.constant 0 : i32
    %2 = arith.cmpi ne, %1, %c0_i32_0 : i32
    scf.if %2 {
      %cst_10 = arith.constant 0.000000e+00 : f32
      %12 = vector.broadcast %cst_10 : f32 to vector<16x128xf32>
      %c0_11 = arith.constant 0 : index
      %c0_12 = arith.constant 0 : index
      %13 = vector.load %arg7[%c0_11, %c0_12] : memref<16x128xf32, #tpu.memory_space<vmem>>, vector<16x128xf32>
      tpu.vector_store %arg7[%c0_11, %c0_12], %12 {strides = array<i32>} : memref<16x128xf32, #tpu.memory_space<vmem>>, vector<16x128xf32>,
    } else {
    }
    %c0 = arith.constant 0 : index
    %c0_1 = arith.constant 0 : index
    %3 = vector.load %arg7[%c0, %c0_1] : memref<16x128xf32, #tpu.memory_space<vmem>>, vector<16x128xf32>
    %c0_2 = arith.constant 0 : index
    %c0_3 = arith.constant 0 : index
    %4 = vector.load %arg3[%c0_2, %c0_3] : memref<16x128xf32, #tpu.memory_space<vmem>>, vector<16x128xf32>
    %c0_4 = arith.constant 0 : index
    %c0_5 = arith.constant 0 : index
    %5 = vector.load %arg4[%c0_4, %c0_5] : memref<128x128xf32, #tpu.memory_space<vmem>>, vector<128x128xf32>
    %cst = arith.constant dense<0.000000e+00> : vector<16x128xf32>
    %6 = tpu.matmul %4, %5, %cst {dimension_numbers = #tpu.dot_dimension_numbers<[1], [1], [0], [0], [0, 0, 1, 0], [], []>} : vector<16x128xf32>, vector<128x128xf32>, vector<16x128xf32> -> vector<16x128xf32>
    %7 = arith.addf %3, %6 : vector<16x128xf32>
    %c0_6 = arith.constant 0 : index
    %c0_7 = arith.constant 0 : index
    %8 = vector.load %arg7[%c0_6, %c0_7] : memref<16x128xf32, #tpu.memory_space<vmem>>, vector<16x128xf32>
    tpu.vector_store %arg7[%c0_6, %c0_7], %7 {strides = array<i32>} : memref<16x128xf32, #tpu.memory_space<vmem>>, vector<16x128xf32>,
    %c0_i32_8 = arith.constant 0 : i32
    %9 = arith.cmpi eq, %arg2, %c0_i32_8 : i32
    %10 = arith.extui %9 : i1 to i32
    %c0_i32_9 = arith.constant 0 : i32
    %11 = arith.cmpi ne, %10, %c0_i32_9 : i32
    scf.if %11 {
      %c0_10 = arith.constant 0 : index
      %c0_11 = arith.constant 0 : index
      %12 = vector.load %arg7[%c0_10, %c0_11] : memref<16x128xf32, #tpu.memory_space<vmem>>, vector<16x128xf32>
      %c0_12 = arith.constant 0 : index
      %c0_13 = arith.constant 0 : index
      %13 = vector.load %arg5[%c0_12, %c0_13] : memref<1x128xf32, #tpu.memory_space<vmem>>, vector<1x128xf32>
      %14 = vector.broadcast %13 : vector<1x128xf32> to vector<16x128xf32>
      %15 = arith.addf %12, %14 : vector<16x128xf32>
      %cst_14 = arith.constant 0.000000e+00 : f32
      %16 = vector.broadcast %cst_14 : f32 to vector<16x128xf32>
      %17 = arith.maximumf %15, %16 : vector<16x128xf32>
      %c0_15 = arith.constant 0 : index
      %c0_16 = arith.constant 0 : index
      %18 = vector.load %arg6[%c0_15, %c0_16] : memref<16x128xf32, #tpu.memory_space<vmem>>, vector<16x128xf32>
      tpu.vector_store %arg6[%c0_15, %c0_16], %17 {strides = array<i32>} : memref<16x128xf32, #tpu.memory_space<vmem>>, vector<16x128xf32>,
    } else {
    }
    return
  }
  func.func @transform_0(%arg0: i32, %arg1: i32, %arg2: i32) -> (i32, i32) {
    %c0_i32 = arith.constant 0 : i32
    return %arg0, %arg2 : i32, i32
  }
  func.func @transform_1(%arg0: i32, %arg1: i32, %arg2: i32) -> (i32, i32) {
    %c0_i32 = arith.constant 0 : i32
    return %arg1, %arg2 : i32, i32
  }
  func.func @transform_2(%arg0: i32, %arg1: i32, %arg2: i32) -> (i32, i32) {
    %c0_i32 = arith.constant 0 : i32
    %c0_i32_0 = arith.constant 0 : i32
    return %c0_i32, %arg1 : i32, i32
  }
  func.func @transform_3(%arg0: i32, %arg1: i32, %arg2: i32) -> (i32, i32) {
    %c0_i32 = arith.constant 0 : i32
    return %arg0, %arg1 : i32, i32
  }
}

</mosaic_0001>

<bundles_post_ra>
// kernel: shared_decoder_forward.1
= control target key start
LH: loop header
LB: loop body
LE: loop exit
PB: predicated region body
PF: predicated region fallthrough
CT: control target
= control target key end

     0   :  { %s316_s0 = inlined_call_operand.vmem [shape: f32[16,128], index: 0, kind: input, shape index: {}]   ;;  %s317_s1 = inlined_call_operand.vmem [shape: f32[128,128], index: 1, kind: input, shape index: {}]   ;;  %s318_s2 = inlined_call_operand.vmem [shape: f32[1,128], index: 2, kind: input, shape index: {}]   ;;  %s319_s3 = inlined_call_operand.hbm [shape: f32[16,128], index: 3, kind: output, shape index: {}]  }
   0x1   :  { %v40_v0 = vld [vmem:[%s317_s1 + $0x78] sm:$0xff]  ;;  %v39_v1 = vld [vmem:[%s317_s1 + $0x70] sm:$0xff]  ;;  %v38_v2 = vld [vmem:[%s317_s1 + $0x68] sm:$0xff] }
   0x2   :  { %173 = vmatprep.subr.mxu0 %v40_v0  ;;  %v23_v3 = vld [vmem:[%s316_s0] sm:$0xff] }
   0x3   :  { %174 = vmatpush3.xpose.msra.mxu0 %v40_v0  ;;  %205 = vmatprep.mubr.f32.mxu0 %v23_v3 }
   0x4   :  { %175 = vmatprep.subr.mxu0 %v39_v1 }
   0x7   :  { %176 = vmatpush3.xpose.msra.mxu0 %v39_v1 }
   0x8   :  { %8 = vsyncpa [#allocation4], 0  ;;  %177 = vmatprep.subr.mxu0 %v38_v2  ;;  %v37_v4 = vld [vmem:[%s317_s1 + $0x60] sm:$0xff]  ;;  %v36_v5 = vld [vmem:[%s317_s1 + $0x58] sm:$0xff]  ;;  %s233_s23 = smov [#allocation3]  }
   0x9   :  { %v35_v6 = vld [vmem:[%s317_s1 + $0x50] sm:$0xff]  ;;  %v34_v7 = vld [vmem:[%s317_s1 + $0x48] sm:$0xff]  ;;  %v33_v8 = vld [vmem:[%s317_s1 + $0x40] sm:$0xff]  ;;  %s143_s24 = sshll.u32 %s233_s23, 4  ;;  %s144_s24 = int_to_ptr.vmem [resolvable:$true] %s143_s24 }
   0xa   :  { %v32_v9 = vld [vmem:[%s317_s1 + $0x38] sm:$0xff]  ;;  %v31_v10 = vld [vmem:[%s317_s1 + $0x30] sm:$0xff]  ;;  %v30_v11 = vld [vmem:[%s317_s1 + $0x28] sm:$0xff]  ;;  %p216_p1 = scmp.lt.s32.totalorder %s144_s24, %s144_s24 }
   0xb   :  { %178 = vmatpush3.xpose.msra.mxu0 %v38_v2  ;;  %v29_v12 = vld [vmem:[%s317_s1 + $0x20] sm:$0xff]  ;;  %v28_v13 = vld [vmem:[%s317_s1 + $0x18] sm:$0xff]  ;;  %v27_v14 = vld [vmem:[%s317_s1 + $0x10] sm:$0xff] }
   0xc   :  { %179 = vmatprep.subr.mxu0 %v37_v4  ;;  %v26_v15 = vld [vmem:[%s317_s1 + $0x8] sm:$0xff]  ;;  %v25_v16 = vld [vmem:[%s317_s1] sm:$0xff]  ;;  %s211_s1 = scalar_lea.vmem %s144_s24, 256 }
   0xd   :  { %v24_v17 = vld [vmem:[%s316_s0 + $0x8] sm:$0xff]  ;;  %v154_v18 = vld [vmem:[%s318_s2] ss:$0 sm:$0xff]  ;;  %p212_p0 = scmp.ne.s32.totalorder %s144_s24, %s211_s1  ;;  %p217_p2 = scmp.lt.s32.totalorder %s211_s1, %s211_s1 }
   0xf   :  { %180 = vmatpush3.xpose.msra.mxu0 %v37_v4  ;;  %p218_p3 = por %p217_p2, %p216_p1 }
  0x10   :  { %181 = vmatprep.subr.mxu0 %v36_v5 }
  0x11   :  { %p219_p4 = pnand %p218_p3, %p212_p0 }
  0x13   :  { %182 = vmatpush3.xpose.msra.mxu0 %v36_v5 }
  0x14   :  { %183 = vmatprep.subr.mxu0 %v35_v6 }
  0x17   :  { %184 = vmatpush3.xpose.msra.mxu0 %v35_v6 }
  0x18   :  { %185 = vmatprep.subr.mxu0 %v34_v7 }
  0x1b   :  { %186 = vmatpush3.xpose.msra.mxu0 %v34_v7 }
  0x1c   :  { %187 = vmatprep.subr.mxu0 %v33_v8 }
  0x1f   :  { %188 = vmatpush3.xpose.msra.mxu0 %v33_v8 }
  0x20   :  { %189 = vmatprep.subr.mxu0 %v32_v9 }
  0x23   :  { %190 = vmatpush3.xpose.msra.mxu0 %v32_v9 }
  0x24   :  { %191 = vmatprep.subr.mxu0 %v31_v10 }
  0x27   :  { %192 = vmatpush3.xpose.msra.mxu0 %v31_v10 }
  0x28   :  { %193 = vmatprep.subr.mxu0 %v30_v11 }
  0x2b   :  { %194 = vmatpush3.xpose.msra.mxu0 %v30_v11 }
  0x2c   :  { %195 = vmatprep.subr.mxu0 %v29_v12 }
  0x2f   :  { %196 = vmatpush3.xpose.msra.mxu0 %v29_v12 }
  0x30   :  { %197 = vmatprep.subr.mxu0 %v28_v13 }
  0x33   :  { %198 = vmatpush3.xpose.msra.mxu0 %v28_v13 }
  0x34   :  { %199 = vmatprep.subr.mxu0 %v27_v14 }
  0x37   :  { %200 = vmatpush3.xpose.msra.mxu0 %v27_v14 }
  0x38   :  { %201 = vmatprep.subr.mxu0 %v26_v15 }
  0x3b   :  { %202 = vmatpush3.xpose.msra.mxu0 %v26_v15 }
  0x3c   :  { %203 = vmatprep.subr.mxu0 %v25_v16 }
  0x3f   :  { %204 = vmatpush3.xpose.msra.mxu0 %v25_v16 }
  0x42   :  { %206 = vmatmul.mubr.f32.vlgmr.msra.gmra.mxu0 %v24_v17 }
 0x102   :  { %v207_v19 = vpop.f32.mrf.mxu0 }
 0x103   :  { %v133_v20 = vadd.f32 %v207_v19, %v154_v18 }
 0x104   :  { %v107_v21 = vpop.f32.mrf.mxu0 }
 0x105   :  { %v135_v22 = vmax.f32 %v133_v20, 0.0  ;;  %v132_v23 = vadd.f32 %v154_v18, %v107_v21 }
 0x107   :  { %137 = vst [vmem:[#allocation3 + $0x8] sm:$0xff] %v135_v22  ;;  %v134_v24 = vmax.f32 %v132_v23, 0.0 }
 0x109   :  { %136 = vst [vmem:[#allocation3] sm:$0xff] %v134_v24 }
 0x10a   :  { %222 = shalt.err (!%p219_p4)
}
 0x10b   :  { %s234_s0 = smov 128   ;;  %s235_s2 = smov 8  }
 0x10c   :  { %149 = dma.vmem_to_hbm [thread:$0]  %s144_s24, 256, %s319_s3, [#allocation4], %s234_s0, %s234_s0, %s235_s2  }
 0x10d   :  { %231 = dma.done.wait [#allocation4], 256  }
 0x10e   :  { %232 = vsyncadd [#allocation4], 4294967040 }
 0x10f   :  { %153 = vsyncpa [#allocation4], 1 }

</bundles_post_ra>
